<compile_context>
chip_gen: v6e
topology: v6e:2x2x1
jax: 0.10.0
libtpu: 0.0.40
codegen_flags: <defaults>
</compile_context>

<pallas_src>
import numpy as np
import jax
import jax.numpy as jnp
from jax.experimental import pallas as pl
from jax.experimental.pallas import tpu as pltpu

WIN = 7            # window_size
K1 = 0.01
K2 = 0.03
DATA_RANGE = 1.0
# Deterministic synthetic "normalizer": denormalize(x) = x * NORM_STD + NORM_MEAN
NORM_MEAN = 0.5
NORM_STD = 0.25


def _banded(out_dim, in_dim):
    """(out_dim, in_dim) banded matrix: row i has 1/WIN at columns i..i+WIN-1."""
    r = np.arange(out_dim)[:, None]
    c = np.arange(in_dim)[None, :]
    return (((c >= r) & (c < r + WIN)).astype(np.float32)) * (1.0 / WIN)


def _planes_per_step(nplanes, w):
    """Largest divisor of nplanes whose packed lane width stays modest (<= ~512)."""
    cap = max(w, 512)
    best = 1
    for p in range(1, nplanes + 1):
        if nplanes % p == 0 and p * w <= cap:
            best = p
    return best


def _make_ssim_kernel():
    c1 = (K1 * DATA_RANGE) ** 2
    c2 = (K2 * DATA_RANGE) ** 2

    def kernel(img1_ref, img2_ref, mask_ref, bh_ref, bw_ref, out_ref):
        # slabs: (1, h, P*w) -> (h, P*w); P planes packed along the lane axis.
        m = mask_ref[0].astype(jnp.float32)
        x = jnp.clip(img1_ref[0].astype(jnp.float32) * NORM_STD + NORM_MEAN,
                     0.0, 1.0) * m
        y = jnp.clip(img2_ref[0].astype(jnp.float32) * NORM_STD + NORM_MEAN,
                     0.0, 1.0) * m

        bh = bh_ref[...]            # (h_out, h), rows = 1/WIN band
        bw = bw_ref[...]            # (P*w, P*w_out), block-diagonal per plane

        def wmean(q):               # uniform WIN x WIN "valid" box filter on MXU
            r = jnp.dot(bh, q, preferred_element_type=jnp.float32)
            return jnp.dot(r, bw, preferred_element_type=jnp.float32)

        mu_x = wmean(x)
        mu_y = wmean(y)
        mu_xx = wmean(x * x)
        mu_yy = wmean(y * y)
        mu_xy = wmean(x * y)

        sigma_x = mu_xx - mu_x * mu_x
        sigma_y = mu_yy - mu_y * mu_y
        sigma_xy = mu_xy - mu_x * mu_y

        num = (2.0 * mu_x * mu_y + c1) * (2.0 * sigma_xy + c2)
        den = (mu_x * mu_x + mu_y * mu_y + c1) * (sigma_x + sigma_y + c2)
        ssim_map = num * pl.reciprocal(den, approx=False)   # EUP, exact

        out_ref[...] = jnp.broadcast_to(jnp.sum(ssim_map), out_ref.shape)

    return kernel


def ssim_loss_forward(img1, mask, img2, idxs):
    """Returns (ssim_idx, img1, img2), mirroring SSIMLoss.forward.

    idxs: int32 (b, number) table of selected channel indices per batch element
    (host-side equivalent of torch.nonzero on mask.sum(dim=(2,3)) > 0).
    """
    b, c, h, w = img1.shape
    _, number = idxs.shape
    h_out = h - WIN + 1
    w_out = w - WIN + 1
    nplanes = b * number

    # --- XLA-side pre-gather + mask fold (cheap layout plumbing) -------------
    gidx = idxs[:, :, None, None]
    img1_sel = jnp.take_along_axis(img1, gidx, axis=1)      # (b, number, h, w)
    img2_sel = jnp.take_along_axis(img2, gidx, axis=1)
    mask_sel = jnp.take_along_axis(mask, gidx, axis=1)
    mask_comb = mask_sel * mask_sel[:, 0:1]                  # mask[b,c]*mask[b,c0]

    P = _planes_per_step(nplanes, w)
    ngroups = nplanes // P
    lane = P * w
    lane_out = P * w_out

    def to_slab(a):
        # (b, number, h, w) -> (ngroups, h, P*w): P planes side-by-side in lanes.
        a = a.reshape(ngroups, P, h, w)
        a = jnp.transpose(a, (0, 2, 1, 3))
        return a.reshape(ngroups, h, lane)

    img1_slab = to_slab(img1_sel)
    img2_slab = to_slab(img2_sel)
    mask_slab = to_slab(mask_comb)

    # Banded box-filter matrices for the MXU.
    bh = jnp.asarray(_banded(h_out, h))                                  # (h_out, h)
    bw = jnp.asarray(np.kron(np.eye(P, dtype=np.float32),
                             _banded(w_out, w).T))                       # (P*w, P*w_out)

    flops = ngroups * (5 * 2 * (h_out * h * lane + h_out * lane * lane_out)
                       + 40 * (h * lane + h_out * lane_out))
    cost = pl.CostEstimate(
        flops=int(flops),
        transcendentals=int(ngroups * h_out * lane_out),
        bytes_accessed=int(4 * (3 * nplanes * h * w
                                + h_out * h + lane * lane_out + ngroups)),
    )

    slab_spec = pl.BlockSpec((1, h, lane), lambda g: (g, 0, 0))

    # TODO(synk): for very large h*w (v7x's 64 MiB VMEM), strip-mine H inside the
    # grid with a WIN-1 halo instead of whole-plane slabs; bf16 inputs would also
    # halve HBM traffic if the producer can supply them.
    partial = pl.pallas_call(
        _make_ssim_kernel(),
        out_shape=jax.ShapeDtypeStruct((ngroups, 1, 1), jnp.float32),
        grid=(ngroups,),
        in_specs=[
            slab_spec, slab_spec, slab_spec,
            pl.BlockSpec((h_out, h), lambda g: (0, 0)),
            pl.BlockSpec((lane, lane_out), lambda g: (0, 0)),
        ],
        out_specs=pl.BlockSpec((1, 1, 1), lambda g: (g, 0, 0)),
        compiler_params=pltpu.CompilerParams(
            dimension_semantics=("parallel",),
            vmem_limit_bytes=64 * 1024 * 1024),
        cost_estimate=cost,
    )(img1_slab, img2_slab, mask_slab, bh, bw)

    ssim_idx = jnp.sum(partial) * (10.0 / float(nplanes * h_out * w_out))
    return ssim_idx, img1, img2


def _reference_ssim(img1, mask, img2, idxs):
    """Pure-JAX reference (shift-add box filter) for a sanity check."""
    h, w = img1.shape[2], img1.shape[3]
    h_out, w_out = h - WIN + 1, w - WIN + 1
    gidx = idxs[:, :, None, None]
    i1 = jnp.take_along_axis(img1, gidx, axis=1)
    i2 = jnp.take_along_axis(img2, gidx, axis=1)
    ms = jnp.take_along_axis(mask, gidx, axis=1)
    m = ms * ms[:, 0:1]
    x = jnp.clip(i1 * NORM_STD + NORM_MEAN, 0.0, 1.0) * m
    y = jnp.clip(i2 * NORM_STD + NORM_MEAN, 0.0, 1.0) * m

    def box(a):
        r = sum(a[:, :, di:di + h_out, :] for di in range(WIN))
        o = sum(r[:, :, :, dj:dj + w_out] for dj in range(WIN))
        return o / float(WIN * WIN)

    mu_x, mu_y = box(x), box(y)
    mu_xx, mu_yy, mu_xy = box(x * x), box(y * y), box(x * y)
    sx, sy, sxy = mu_xx - mu_x ** 2, mu_yy - mu_y ** 2, mu_xy - mu_x * mu_y
    c1 = (K1 * DATA_RANGE) ** 2
    c2 = (K2 * DATA_RANGE) ** 2
    ssim = ((2 * mu_x * mu_y + c1) * (2 * sxy + c2)) / \
           ((mu_x ** 2 + mu_y ** 2 + c1) * (sx + sy + c2))
    return jnp.mean(ssim) * 10.0


if __name__ == "__main__":
    b, c, h, w = 2, 4, 16, 16
    key = jax.random.PRNGKey(0)
    kk1, kk2, kk3 = jax.random.split(key, 3)

    img1 = jax.random.normal(kk1, (b, c, h, w), jnp.float32)
    img2 = jax.random.normal(kk2, (b, c, h, w), jnp.float32)

    # Binary mask with the SAME number of active channels per batch element
    # (the reference code requires this for its .view(b, number)).
    m_spatial = (jax.random.uniform(kk3, (b, c, h, w)) > 0.3).astype(jnp.float32)
    chan_active = (jnp.zeros((b, c, 1, 1), jnp.float32)
                   .at[:, 1].set(1.0)
                   .at[:, 3].set(1.0))
    mask = m_spatial * chan_active

    # glue: data-dependent channel selection (torch.nonzero) done host-side
    # TODO(synk): torch.nonzero has no static-shape Pallas equivalent; selection
    # indices are computed on the concrete mask and fed as a static index table.
    mask_np = np.asarray(mask)
    active = mask_np.sum(axis=(2, 3)) > 0
    number = int(active[0].sum())
    idxs = np.stack(
        [np.nonzero(active[bi])[0][:number] for bi in range(b)]
    ).astype(np.int32)
    idxs = jnp.asarray(idxs)

    ssim_idx, out1, out2 = ssim_loss_forward(img1, mask, img2, idxs)
    jax.block_until_ready(ssim_idx)

    ref = _reference_ssim(img1, mask, img2, idxs)
    if not np.allclose(float(ssim_idx), float(ref), rtol=1e-2, atol=1e-2):
        raise AssertionError(f"mismatch: kernel={float(ssim_idx)} ref={float(ref)}")

    print("KERNEL_OK")
</pallas_src>

<mosaic_0001>
module attributes {stable_mosaic.version = 11 : i64} {
  func.func @kernel(%arg0: i32, %arg1: memref<1x16x64xf32, #tpu.memory_space<vmem>>, %arg2: memref<1x16x64xf32, #tpu.memory_space<vmem>>, %arg3: memref<1x16x64xf32, #tpu.memory_space<vmem>>, %arg4: memref<10x16xf32, #tpu.memory_space<vmem>>, %arg5: memref<64x40xf32, #tpu.memory_space<vmem>>, %arg6: memref<1x1x1xf32, #tpu.memory_space<vmem>>) attributes {dimension_semantics = [#tpu.dimension_semantics<parallel>], iteration_bounds = array<i64: 1>, scalar_prefetch = 0 : i64, scratch_operands = 0 : i64, tpu.core_type = #tpu.core_type<tc>, window_params = [{transform_indices = @transform_0, window_bounds = array<i64: 1, 16, 64>}, {transform_indices = @transform_1, window_bounds = array<i64: 1, 16, 64>}, {transform_indices = @transform_2, window_bounds = array<i64: 1, 16, 64>}, {pipeline_mode = #tpu.pipeline_mode<synchronous>, transform_indices = @transform_3, window_bounds = array<i64: 10, 16>}, {pipeline_mode = #tpu.pipeline_mode<synchronous>, transform_indices = @transform_4, window_bounds = array<i64: 64, 40>}, {transform_indices = @transform_5, window_bounds = array<i64: 1, 1, 1>}]} {
    %c0 = arith.constant 0 : index
    %c0_0 = arith.constant 0 : index
    %c0_1 = arith.constant 0 : index
    %0 = vector.load %arg3[%c0, %c0_0, %c0_1] : memref<1x16x64xf32, #tpu.memory_space<vmem>>, vector<1x16x64xf32>
    %1 = vector.shape_cast %0 : vector<1x16x64xf32> to vector<16x64xf32>
    %c0_2 = arith.constant 0 : index
    %c0_3 = arith.constant 0 : index
    %c0_4 = arith.constant 0 : index
    %2 = vector.load %arg1[%c0_2, %c0_3, %c0_4] : memref<1x16x64xf32, #tpu.memory_space<vmem>>, vector<1x16x64xf32>
    %3 = vector.shape_cast %2 : vector<1x16x64xf32> to vector<16x64xf32>
    %cst = arith.constant 2.500000e-01 : f32
    %4 = vector.broadcast %cst : f32 to vector<16x64xf32>
    %5 = arith.mulf %3, %4 : vector<16x64xf32>
    %cst_5 = arith.constant 5.000000e-01 : f32
    %6 = vector.broadcast %cst_5 : f32 to vector<16x64xf32>
    %7 = arith.addf %5, %6 : vector<16x64xf32>
    %cst_6 = arith.constant 0.000000e+00 : f32
    %cst_7 = arith.constant 1.000000e+00 : f32
    %8 = vector.broadcast %cst_6 : f32 to vector<16x64xf32>
    %9 = arith.maximumf %8, %7 : vector<16x64xf32>
    %10 = vector.broadcast %cst_7 : f32 to vector<16x64xf32>
    %11 = arith.minimumf %10, %9 : vector<16x64xf32>
    %12 = arith.mulf %11, %1 : vector<16x64xf32>
    %c0_8 = arith.constant 0 : index
    %c0_9 = arith.constant 0 : index
    %c0_10 = arith.constant 0 : index
    %13 = vector.load %arg2[%c0_8, %c0_9, %c0_10] : memref<1x16x64xf32, #tpu.memory_space<vmem>>, vector<1x16x64xf32>
    %14 = vector.shape_cast %13 : vector<1x16x64xf32> to vector<16x64xf32>
    %cst_11 = arith.constant 2.500000e-01 : f32
    %15 = vector.broadcast %cst_11 : f32 to vector<16x64xf32>
    %16 = arith.mulf %14, %15 : vector<16x64xf32>
    %cst_12 = arith.constant 5.000000e-01 : f32
    %17 = vector.broadcast %cst_12 : f32 to vector<16x64xf32>
    %18 = arith.addf %16, %17 : vector<16x64xf32>
    %cst_13 = arith.constant 0.000000e+00 : f32
    %cst_14 = arith.constant 1.000000e+00 : f32
    %19 = vector.broadcast %cst_13 : f32 to vector<16x64xf32>
    %20 = arith.maximumf %19, %18 : vector<16x64xf32>
    %21 = vector.broadcast %cst_14 : f32 to vector<16x64xf32>
    %22 = arith.minimumf %21, %20 : vector<16x64xf32>
    %23 = arith.mulf %22, %1 : vector<16x64xf32>
    %c0_15 = arith.constant 0 : index
    %c0_16 = arith.constant 0 : index
    %24 = vector.load %arg4[%c0_15, %c0_16] : memref<10x16xf32, #tpu.memory_space<vmem>>, vector<10x16xf32>
    %c0_17 = arith.constant 0 : index
    %c0_18 = arith.constant 0 : index
    %25 = vector.load %arg5[%c0_17, %c0_18] : memref<64x40xf32, #tpu.memory_space<vmem>>, vector<64x40xf32>
    %cst_19 = arith.constant dense<0.000000e+00> : vector<10x64xf32>
    %26 = tpu.matmul %24, %12, %cst_19 {dimension_numbers = #tpu.dot_dimension_numbers<[1], [0], [0], [1], [0, 0, 1, 1], [], []>} : vector<10x16xf32>, vector<16x64xf32>, vector<10x64xf32> -> vector<10x64xf32>
    %cst_20 = arith.constant dense<0.000000e+00> : vector<10x40xf32>
    %27 = tpu.matmul %26, %25, %cst_20 {dimension_numbers = #tpu.dot_dimension_numbers<[1], [0], [0], [1], [0, 0, 1, 1], [], []>} : vector<10x64xf32>, vector<64x40xf32>, vector<10x40xf32> -> vector<10x40xf32>
    %cst_21 = arith.constant dense<0.000000e+00> : vector<10x64xf32>
    %28 = tpu.matmul %24, %23, %cst_21 {dimension_numbers = #tpu.dot_dimension_numbers<[1], [0], [0], [1], [0, 0, 1, 1], [], []>} : vector<10x16xf32>, vector<16x64xf32>, vector<10x64xf32> -> vector<10x64xf32>
    %cst_22 = arith.constant dense<0.000000e+00> : vector<10x40xf32>
    %29 = tpu.matmul %28, %25, %cst_22 {dimension_numbers = #tpu.dot_dimension_numbers<[1], [0], [0], [1], [0, 0, 1, 1], [], []>} : vector<10x64xf32>, vector<64x40xf32>, vector<10x40xf32> -> vector<10x40xf32>
    %30 = arith.mulf %12, %12 : vector<16x64xf32>
    %cst_23 = arith.constant dense<0.000000e+00> : vector<10x64xf32>
    %31 = tpu.matmul %24, %30, %cst_23 {dimension_numbers = #tpu.dot_dimension_numbers<[1], [0], [0], [1], [0, 0, 1, 1], [], []>} : vector<10x16xf32>, vector<16x64xf32>, vector<10x64xf32> -> vector<10x64xf32>
    %cst_24 = arith.constant dense<0.000000e+00> : vector<10x40xf32>
    %32 = tpu.matmul %31, %25, %cst_24 {dimension_numbers = #tpu.dot_dimension_numbers<[1], [0], [0], [1], [0, 0, 1, 1], [], []>} : vector<10x64xf32>, vector<64x40xf32>, vector<10x40xf32> -> vector<10x40xf32>
    %33 = arith.mulf %23, %23 : vector<16x64xf32>
    %cst_25 = arith.constant dense<0.000000e+00> : vector<10x64xf32>
    %34 = tpu.matmul %24, %33, %cst_25 {dimension_numbers = #tpu.dot_dimension_numbers<[1], [0], [0], [1], [0, 0, 1, 1], [], []>} : vector<10x16xf32>, vector<16x64xf32>, vector<10x64xf32> -> vector<10x64xf32>
    %cst_26 = arith.constant dense<0.000000e+00> : vector<10x40xf32>
    %35 = tpu.matmul %34, %25, %cst_26 {dimension_numbers = #tpu.dot_dimension_numbers<[1], [0], [0], [1], [0, 0, 1, 1], [], []>} : vector<10x64xf32>, vector<64x40xf32>, vector<10x40xf32> -> vector<10x40xf32>
    %36 = arith.mulf %12, %23 : vector<16x64xf32>
    %cst_27 = arith.constant dense<0.000000e+00> : vector<10x64xf32>
    %37 = tpu.matmul %24, %36, %cst_27 {dimension_numbers = #tpu.dot_dimension_numbers<[1], [0], [0], [1], [0, 0, 1, 1], [], []>} : vector<10x16xf32>, vector<16x64xf32>, vector<10x64xf32> -> vector<10x64xf32>
    %cst_28 = arith.constant dense<0.000000e+00> : vector<10x40xf32>
    %38 = tpu.matmul %37, %25, %cst_28 {dimension_numbers = #tpu.dot_dimension_numbers<[1], [0], [0], [1], [0, 0, 1, 1], [], []>} : vector<10x64xf32>, vector<64x40xf32>, vector<10x40xf32> -> vector<10x40xf32>
    %39 = arith.mulf %27, %27 : vector<10x40xf32>
    %40 = arith.subf %32, %39 : vector<10x40xf32>
    %41 = arith.mulf %29, %29 : vector<10x40xf32>
    %42 = arith.subf %35, %41 : vector<10x40xf32>
    %43 = arith.mulf %27, %29 : vector<10x40xf32>
    %44 = arith.subf %38, %43 : vector<10x40xf32>
    %cst_29 = arith.constant 2.000000e+00 : f32
    %45 = vector.broadcast %cst_29 : f32 to vector<10x40xf32>
    %46 = arith.mulf %45, %27 : vector<10x40xf32>
    %47 = arith.mulf %46, %29 : vector<10x40xf32>
    %cst_30 = arith.constant 9.99999974E-5 : f32
    %48 = vector.broadcast %cst_30 : f32 to vector<10x40xf32>
    %49 = arith.addf %47, %48 : vector<10x40xf32>
    %cst_31 = arith.constant 2.000000e+00 : f32
    %50 = vector.broadcast %cst_31 : f32 to vector<10x40xf32>
    %51 = arith.mulf %50, %44 : vector<10x40xf32>
    %cst_32 = arith.constant 8.99999984E-4 : f32
    %52 = vector.broadcast %cst_32 : f32 to vector<10x40xf32>
    %53 = arith.addf %51, %52 : vector<10x40xf32>
    %54 = arith.mulf %49, %53 : vector<10x40xf32>
    %55 = arith.mulf %27, %27 : vector<10x40xf32>
    %56 = arith.mulf %29, %29 : vector<10x40xf32>
    %57 = arith.addf %55, %56 : vector<10x40xf32>
    %cst_33 = arith.constant 9.99999974E-5 : f32
    %58 = vector.broadcast %cst_33 : f32 to vector<10x40xf32>
    %59 = arith.addf %57, %58 : vector<10x40xf32>
    %60 = arith.addf %40, %42 : vector<10x40xf32>
    %cst_34 = arith.constant 8.99999984E-4 : f32
    %61 = vector.broadcast %cst_34 : f32 to vector<10x40xf32>
    %62 = arith.addf %60, %61 : vector<10x40xf32>
    %63 = arith.mulf %59, %62 : vector<10x40xf32>
    %64 = tpu.reciprocal %63 : vector<10x40xf32> -> vector<10x40xf32>
    %65 = arith.mulf %54, %64 : vector<10x40xf32>
    %66 = vector.shape_cast %65 : vector<10x40xf32> to vector<1x10x40xf32>
    %cst_35 = arith.constant dense<0.000000e+00> : vector<1xf32>
    %67 = vector.multi_reduction <add>, %66, %cst_35 [1, 2] : vector<1x10x40xf32> to vector<1xf32>
    %68 = vector.shape_cast %67 : vector<1xf32> to vector<1x1x1xf32>
    %69 = vector.extract %68[0, 0, 0] : f32 from vector<1x1x1xf32>
    %70 = vector.broadcast %69 : f32 to vector<1x1x1xf32>
    %c0_36 = arith.constant 0 : index
    %c0_37 = arith.constant 0 : index
    %c0_38 = arith.constant 0 : index
    %71 = vector.load %arg6[%c0_36, %c0_37, %c0_38] : memref<1x1x1xf32, #tpu.memory_space<vmem>>, vector<1x1x1xf32>
    tpu.vector_store %arg6[%c0_36, %c0_37, %c0_38], %70 {strides = array<i32>} : memref<1x1x1xf32, #tpu.memory_space<vmem>>, vector<1x1x1xf32>,
    return
  }
  func.func @transform_0(%arg0: i32) -> (i32, i32, i32) {
    %c0_i32 = arith.constant 0 : i32
    %c0_i32_0 = arith.constant 0 : i32
    %c0_i32_1 = arith.constant 0 : i32
    return %arg0, %c0_i32, %c0_i32_0 : i32, i32, i32
  }
  func.func @transform_1(%arg0: i32) -> (i32, i32, i32) {
    %c0_i32 = arith.constant 0 : i32
    %c0_i32_0 = arith.constant 0 : i32
    %c0_i32_1 = arith.constant 0 : i32
    return %arg0, %c0_i32, %c0_i32_0 : i32, i32, i32
  }
  func.func @transform_2(%arg0: i32) -> (i32, i32, i32) {
    %c0_i32 = arith.constant 0 : i32
    %c0_i32_0 = arith.constant 0 : i32
    %c0_i32_1 = arith.constant 0 : i32
    return %arg0, %c0_i32, %c0_i32_0 : i32, i32, i32
  }
  func.func @transform_3(%arg0: i32) -> (i32, i32) {
    %c0_i32 = arith.constant 0 : i32
    %c0_i32_0 = arith.constant 0 : i32
    %c0_i32_1 = arith.constant 0 : i32
    return %c0_i32, %c0_i32_0 : i32, i32
  }
  func.func @transform_4(%arg0: i32) -> (i32, i32) {
    %c0_i32 = arith.constant 0 : i32
    %c0_i32_0 = arith.constant 0 : i32
    %c0_i32_1 = arith.constant 0 : i32
    return %c0_i32, %c0_i32_0 : i32, i32
  }
  func.func @transform_5(%arg0: i32) -> (i32, i32, i32) {
    %c0_i32 = arith.constant 0 : i32
    %c0_i32_0 = arith.constant 0 : i32
    %c0_i32_1 = arith.constant 0 : i32
    return %arg0, %c0_i32, %c0_i32_0 : i32, i32, i32
  }
}

</mosaic_0001>

<bundles_post_ra>
// kernel: tpu_custom_call.1
= control target key start
LH: loop header
LB: loop body
LE: loop exit
PB: predicated region body
PF: predicated region fallthrough
CT: control target
= control target key end

     0   :  { %vm57_vm0 = vcmask 130048   ;;  %s1421_s0 = inlined_call_operand.vmem [shape: f32[1,16,64], index: 0, kind: input, shape index: {}]   ;;  %s1422_s1 = inlined_call_operand.vmem [shape: f32[1,16,64], index: 1, kind: input, shape index: {}]   ;;  %s1423_s2 = inlined_call_operand.vmem [shape: f32[1,16,64], index: 2, kind: input, shape index: {}]   ;;  %s1424_s3 = inlined_call_operand.vmem [shape: f32[10,16], index: 3, kind: input, shape index: {}]   ;;  %s1425_s4 = inlined_call_operand.vmem [shape: f32[64,40], index: 4, kind: input, shape index: {}]   ;;  %s1426_s5 = inlined_call_operand.hbm [shape: f32[1,1,1], index: 5, kind: output, shape index: {}]  }
   0x1   :  { %v24_v0 = vld [vmem:[%s1421_s0 + $0x8] sm:$0xff]  ;;  %v23_v2 = vld [vmem:[%s1421_s0] sm:$0xff]  ;;  %v1222_v7 = vld [vmem:[%s1425_s4 + $0x38] sm:$0xff] }
   0x2   :  { %v26_v1 = vmul.f32 0.25, %v24_v0  ;;  %v1209_v3 = vld [vmem:[%s1424_s3] sm:$0xff]  ;;  %v25_v4 = vmul.f32 0.25, %v23_v2  ;;  %v36_v5 = vld [vmem:[%s1422_s1 + $0x8] sm:$0xff]  ;;  %1017 = vmatprep.subr.mxu1 %v1222_v7  ;;  %v1228_v11 = vld [vmem:[%s1425_s4 + $0x30] sm:$0xff] }
   0x3   :  { %1014 = vmatprep.mubr.msk.f32.mxu0 %vm57_vm0, %v1209_v3  ;;  %v35_v6 = vld [vmem:[%s1422_s1] sm:$0xff]  ;;  %v38_v9 = vmul.f32 0.25, %v36_v5  ;;  %1018 = vmatpush3.msra.mxu1 %v1222_v7  ;;  %v1234_v13 = vld [vmem:[%s1425_s4 + $0x28] sm:$0xff] }
   0x4   :  { %v28_v8 = vadd.f32 0.5, %v26_v1  ;;  %v37_v10 = vmul.f32 0.25, %v35_v6  ;;  %v27_v12 = vadd.f32 0.5, %v25_v4 }
   0x5   :  { %10 = vsyncpa [#allocation3], 0  ;;  %v40_v15 = vadd.f32 0.5, %v38_v9  ;;  %1019 = vmatprep.subr.mxu1 %v1228_v11  ;;  %v22_v17 = vld [vmem:[%s1423_s2 + $0x8] sm:$0xff]  ;;  %v1244_v19 = vld [vmem:[%s1425_s4 + $0x20] sm:$0xff]  ;;  %vm139_vm1 = vcmask 523264  }
   0x6   :  { %v30_v14 = vmax.f32 %v28_v8, 0.0  ;;  %v39_v16 = vadd.f32 0.5, %v37_v10  ;;  %v29_v18 = vmax.f32 %v27_v12, 0.0  ;;  %1020 = vmatpush3.msra.mxu1 %v1228_v11  ;;  %v21_v21 = vld [vmem:[%s1423_s2] sm:$0xff]  ;;  %v1254_v25 = vld [vmem:[%s1425_s4 + $0x18] sm:$0xff]  ;;  %v1265_v30 = vld [vmem:[%s1425_s4 + $0x10] sm:$0xff] }
   0x7   :  { %v42_v22 = vmax.f32 %v40_v15, 0.0  ;;  %1021 = vmatprep.subr.mxu1 %v1234_v13  ;;  %v1275_v32 = vld [vmem:[%s1424_s3 + $0x8] sm:$0x3]  ;;  %v1317_v35 = vld [vmem:[%s1425_s4] sm:$0xff]  ;;  %vm889_vm2 = vcmask 326656   ;;  %vm891_vm3 = vcmask 320512  }
   0x8   :  { %v32_v20 = vmin.f32 %v30_v14, 1.0  ;;  %v41_v23 = vmax.f32 %v39_v16, 0.0  ;;  %v31_v24 = vmin.f32 %v29_v18, 1.0  ;;  %1022 = vmatpush3.msra.mxu1 %v1234_v13  ;;  %v1309_v34 = vld [vmem:[%s1425_s4 + $0x8] sm:$0xff]  ;;  %s1169_s4 = smov [#allocation2]   ;;  %vm904_vm4 = vcmask 0  }
   0x9   :  { %v44_v27 = vmin.f32 %v42_v22, 1.0  ;;  %1023 = vmatprep.subr.mxu1 %v1244_v19  ;;  %s912_s21 = sshll.u32 %s1169_s4, 4  ;;  %s913_s21 = int_to_ptr.vmem [resolvable:$true] %s912_s21 }
   0xa   :  { %v1256_v26 = vmul.f32 %v32_v20, %v22_v17  ;;  %v43_v28 = vmin.f32 %v41_v23, 1.0  ;;  %v1259_v29 = vmul.f32 %v31_v24, %v21_v21  ;;  %1024 = vmatpush3.msra.mxu1 %v1244_v19  ;;  %s1147_s23 = scalar_lea.vmem %s913_s21, 16  ;;  %s1151_s24 = scalar_lea.vmem %s913_s21, 32 }
   0xb   :  { %v1268_v31 = vmul.f32 %v44_v27, %v22_v17  ;;  %1025 = vmatprep.subr.mxu1 %v1254_v25  ;;  %p1148_p0 = scmp.ne.s32.totalorder %s913_s21, %s1147_s23  ;;  %p1152_p1 = scmp.lt.s32.totalorder %s913_s21, %s913_s21 }
   0xc   :  { %1010 = vmatprep.subr.mxu0 %v1256_v26  ;;  %1026 = vmatpush3.msra.mxu1 %v1254_v25  ;;  %v1279_v33 = vmul.f32 %v43_v28, %v21_v21  ;;  %v378_v36 = vmul.f32 %v1256_v26, %v1256_v26  ;;  %v377_v41 = vmul.f32 %v1259_v29, %v1259_v29  ;;  %p1153_p2 = scmp.lt.s32.totalorder %s1151_s24, %s1147_s23 }
   0xd   :  { %1011 = vmatpush3.msra.mxu0 %v1256_v26  ;;  %1027 = vmatprep.subr.mxu1 %v1265_v30  ;;  %v536_v42 = vmul.f32 %v1268_v31, %v1268_v31  ;;  %v694_v44 = vmul.f32 %v1268_v31, %v1256_v26 }
   0xe   :  { %1012 = vmatprep.subr.mxu0 %v1259_v29  ;;  %1028 = vmatpush3.msra.mxu1 %v1265_v30  ;;  %v535_v43 = vmul.f32 %v1279_v33, %v1279_v33  ;;  %v693_v56 = vmul.f32 %v1279_v33, %v1259_v29  ;;  %p1154_p3 = por %p1153_p2, %p1152_p1 }
   0xf   :  { %1013 = vmatpush3.msra.mxu0 %v1259_v29  ;;  %1029 = vmatprep.subr.mxu1 %v1309_v34 }
  0x10   :  { %1015 = vmatmul.mubr.msk.f32.vlgmr.msra.gmra.mxu0 %vm57_vm0, %v1275_v32  ;;  %1036 = vmatprep.subr.mxu0 %v1268_v31  ;;  %p1155_p4 = pnand %p1154_p3, %p1148_p0 }
  0x11   :  { %1037 = vmatpush3.msra.mxu0 %v1268_v31  ;;  %1040 = vmatprep.mubr.msk.f32.mxu0 %vm57_vm0, %v1209_v3 }
  0x12   :  { %1038 = vmatprep.subr.mxu0 %v1279_v33  ;;  %1030 = vmatpush3.msra.mxu1 %v1309_v34 }
  0x13   :  { %1039 = vmatpush3.msra.mxu0 %v1279_v33  ;;  %1031 = vmatprep.subr.mxu1 %v1317_v35 }
  0x14   :  { %1041 = vmatmul.mubr.msk.f32.vlgmr.msra.gmra.mxu0 %vm57_vm0, %v1275_v32  ;;  %1043 = vmatprep.subr.mxu0 %v1222_v7 }
  0x15   :  { %1044 = vmatpush3.msra.mxu0 %v1222_v7  ;;  %1032 = vmatpush3.msra.mxu1 %v1317_v35 }
  0x16   :  { %1045 = vmatprep.subr.mxu0 %v1228_v11  ;;  %1069 = vmatprep.subr.mxu1 %v1222_v7 }
  0x17   :  { %1046 = vmatpush3.msra.mxu0 %v1228_v11 }
  0x18   :  { %1047 = vmatprep.subr.mxu0 %v1234_v13 }
  0x19   :  { %1048 = vmatpush3.msra.mxu0 %v1234_v13 }
  0x1a   :  { %1049 = vmatprep.subr.mxu0 %v1244_v19 }
  0x1b   :  { %1050 = vmatpush3.msra.mxu0 %v1244_v19 }
  0x1c   :  { %1051 = vmatprep.subr.mxu0 %v1254_v25 }
  0x1d   :  { %1052 = vmatpush3.msra.mxu0 %v1254_v25 }
  0x1e   :  { %1053 = vmatprep.subr.mxu0 %v1265_v30 }
  0x1f   :  { %1054 = vmatpush3.msra.mxu0 %v1265_v30 }
  0x20   :  { %1055 = vmatprep.subr.mxu0 %v1309_v34 }
  0x21   :  { %1056 = vmatpush3.msra.mxu0 %v1309_v34 }
  0x22   :  { %1057 = vmatprep.subr.mxu0 %v1317_v35 }
  0x23   :  { %1058 = vmatpush3.msra.mxu0 %v1317_v35 }
  0x24   :  { %1062 = vmatprep.subr.mxu0 %v378_v36 }
  0xd0   :  { %v1016_v37 = vpop.f32.mrf.mxu0 }
  0xd2   :  { %v130_v38 = vpop.f32.mrf.mxu0 }
  0xd3   :  { %1033 = vmatprep.mubr.msk.f32.mxu1 %vm139_vm1, %v130_v38 }
  0xd4   :  { %1034 = vmatmul.mubr.msk.f32.vlgmr.msra.gmra.mxu1 %vm139_vm1, %v1016_v37  ;;  %v1042_v39 = vpop.f32.mrf.mxu0 }
  0xd5   :  { %1070 = vmatpush3.msra.mxu1 %v1222_v7 }
  0xd6   :  { %v287_v40 = vpop.f32.mrf.mxu0  ;;  %1071 = vmatprep.subr.mxu1 %v1228_v11 }
  0xd7   :  { %1059 = vmatprep.mubr.msk.f32.mxu0 %vm139_vm1, %v287_v40  ;;  %1072 = vmatpush3.msra.mxu1 %v1228_v11 }
  0xd8   :  { %1060 = vmatmul.mubr.msk.f32.vlgmr.msra.gmra.mxu0 %vm139_vm1, %v1042_v39  ;;  %1073 = vmatprep.subr.mxu1 %v1234_v13 }
  0xd9   :  { %1063 = vmatpush3.msra.mxu0 %v378_v36  ;;  %1066 = vmatprep.mubr.msk.f32.mxu0 %vm57_vm0, %v1209_v3 }
  0xda   :  { %1064 = vmatprep.subr.mxu0 %v377_v41  ;;  %1074 = vmatpush3.msra.mxu1 %v1234_v13 }
  0xdb   :  { %1065 = vmatpush3.msra.mxu0 %v377_v41  ;;  %1075 = vmatprep.subr.mxu1 %v1244_v19 }
  0xdc   :  { %1067 = vmatmul.mubr.msk.f32.vlgmr.msra.gmra.mxu0 %vm57_vm0, %v1275_v32  ;;  %1088 = vmatprep.subr.mxu0 %v536_v42 }
  0xdd   :  { %1089 = vmatpush3.msra.mxu0 %v536_v42  ;;  %1092 = vmatprep.mubr.msk.f32.mxu0 %vm57_vm0, %v1209_v3 }
  0xde   :  { %1090 = vmatprep.subr.mxu0 %v535_v43  ;;  %1076 = vmatpush3.msra.mxu1 %v1244_v19 }
  0xdf   :  { %1091 = vmatpush3.msra.mxu0 %v535_v43  ;;  %1077 = vmatprep.subr.mxu1 %v1254_v25 }
  0xe0   :  { %1093 = vmatmul.mubr.msk.f32.vlgmr.msra.gmra.mxu0 %vm57_vm0, %v1275_v32  ;;  %1095 = vmatprep.subr.mxu0 %v1222_v7 }
  0xe1   :  { %1096 = vmatpush3.msra.mxu0 %v1222_v7  ;;  %1078 = vmatpush3.msra.mxu1 %v1254_v25 }
  0xe2   :  { %1097 = vmatprep.subr.mxu0 %v1228_v11  ;;  %1079 = vmatprep.subr.mxu1 %v1265_v30 }
  0xe3   :  { %1098 = vmatpush3.msra.mxu0 %v1228_v11  ;;  %1080 = vmatpush3.msra.mxu1 %v1265_v30 }
  0xe4   :  { %1099 = vmatprep.subr.mxu0 %v1234_v13  ;;  %1081 = vmatprep.subr.mxu1 %v1309_v34 }
  0xe5   :  { %1100 = vmatpush3.msra.mxu0 %v1234_v13  ;;  %1082 = vmatpush3.msra.mxu1 %v1309_v34 }
  0xe6   :  { %1101 = vmatprep.subr.mxu0 %v1244_v19  ;;  %1083 = vmatprep.subr.mxu1 %v1317_v35 }
  0xe7   :  { %1102 = vmatpush3.msra.mxu0 %v1244_v19  ;;  %1084 = vmatpush3.msra.mxu1 %v1317_v35 }
  0xe8   :  { %1103 = vmatprep.subr.mxu0 %v1254_v25  ;;  %1114 = vmatprep.subr.mxu1 %v694_v44 }
  0xe9   :  { %1104 = vmatpush3.msra.mxu0 %v1254_v25 }
  0xea   :  { %1105 = vmatprep.subr.mxu0 %v1265_v30 }
  0xeb   :  { %1106 = vmatpush3.msra.mxu0 %v1265_v30 }
  0xec   :  { %1107 = vmatprep.subr.mxu0 %v1309_v34 }
  0xed   :  { %1108 = vmatpush3.msra.mxu0 %v1309_v34 }
  0xee   :  { %1109 = vmatprep.subr.mxu0 %v1317_v35 }
  0xef   :  { %1110 = vmatpush3.msra.mxu0 %v1317_v35 }
 0x194   :  { %v1035_v45 = vpop.f32.mrf.mxu1 }
 0x195   :  { %v864_v46 = vmul.f32 2.0, %v1035_v45  ;;  %v852_v49 = vmul.f32 %v1035_v45, %v1035_v45 }
 0x196   :  { %v212_v59 = vpop.f32.mrf.mxu1 }
 0x197   :  { %v851_v2 = vmul.f32 %v212_v59, %v212_v59  ;;  %v863_v18 = vmul.f32 2.0, %v212_v59 }
 0x198   :  { %v1061_v47 = vpop.f32.mrf.mxu0 }
 0x199   :  { %v1378_v48 = vmul.f32 %v1061_v47, %v864_v46  ;;  %v856_v50 = vmul.f32 %v1061_v47, %v1061_v47  ;;  %v1380_v51 = vmul.f32 %v1061_v47, %v1035_v45 }
 0x19a   :  { %v1382_v52 = vpop.f32.mrf.mxu0 }
 0x19b   :  { %v876_v53 = vadd.f32 %v856_v50, %v852_v49  ;;  %v855_v63 = vmul.f32 %v1382_v52, %v1382_v52  ;;  %v859_v20 = vmul.f32 %v1382_v52, %v212_v59  ;;  %v865_v22 = vmul.f32 %v863_v18, %v1382_v52 }
 0x19c   :  { %v1068_v54 = vpop.f32.mrf.mxu0 }
 0x19d   :  { %v875_v9 = vadd.f32 %v855_v63, %v851_v2  ;;  %v878_v10 = vadd.f32 0.0001, %v876_v53  ;;  %v867_v28 = vadd.f32 0.0001, %v865_v22 }
 0x19e   :  { %v445_v55 = vpop.f32.mrf.mxu0 }
 0x19f   :  { %1085 = vmatprep.mubr.msk.f32.mxu1 %vm139_vm1, %v445_v55  ;;  %v877_v14 = vadd.f32 0.0001, %v875_v9 }
 0x1a0   :  { %1086 = vmatmul.mubr.msk.f32.vlgmr.msra.gmra.mxu1 %vm139_vm1, %v1068_v54  ;;  %v1094_v57 = vpop.f32.mrf.mxu0 }
 0x1a1   :  { %1115 = vmatpush3.msra.mxu1 %v694_v44  ;;  %1118 = vmatprep.mubr.msk.f32.mxu1 %vm57_vm0, %v1209_v3 }
 0x1a2   :  { %v603_v58 = vpop.f32.mrf.mxu0  ;;  %1116 = vmatprep.subr.mxu1 %v693_v56 }
 0x1a3   :  { %1111 = vmatprep.mubr.msk.f32.mxu0 %vm139_vm1, %v603_v58  ;;  %1117 = vmatpush3.msra.mxu1 %v693_v56 }
 0x1a4   :  { %1112 = vmatmul.mubr.msk.f32.vlgmr.msra.gmra.mxu0 %vm139_vm1, %v1094_v57  ;;  %1119 = vmatmul.mubr.msk.f32.vlgmr.msra.gmra.mxu1 %vm57_vm0, %v1275_v32 }
 0x1a5   :  { %1121 = vmatprep.subr.mxu1 %v1222_v7 }
 0x1a6   :  { %1122 = vmatpush3.msra.mxu1 %v1222_v7 }
 0x1a7   :  { %1123 = vmatprep.subr.mxu1 %v1228_v11 }
 0x1a8   :  { %1124 = vmatpush3.msra.mxu1 %v1228_v11 }
 0x1a9   :  { %1125 = vmatprep.subr.mxu1 %v1234_v13 }
 0x1aa   :  { %1126 = vmatpush3.msra.mxu1 %v1234_v13 }
 0x1ab   :  { %1127 = vmatprep.subr.mxu1 %v1244_v19 }
 0x1ac   :  { %1128 = vmatpush3.msra.mxu1 %v1244_v19 }
 0x1ad   :  { %1129 = vmatprep.subr.mxu1 %v1254_v25 }
 0x1ae   :  { %1130 = vmatpush3.msra.mxu1 %v1254_v25  ;;  %v868_v25 = vadd.f32 0.0001, %v1378_v48 }
 0x1af   :  { %1131 = vmatprep.subr.mxu1 %v1265_v30 }
 0x1b0   :  { %1132 = vmatpush3.msra.mxu1 %v1265_v30 }
 0x1b1   :  { %1133 = vmatprep.subr.mxu1 %v1309_v34 }
 0x1b2   :  { %1134 = vmatpush3.msra.mxu1 %v1309_v34 }
 0x1b3   :  { %1135 = vmatprep.subr.mxu1 %v1317_v35 }
 0x1b4   :  { %1136 = vmatpush3.msra.mxu1 %v1317_v35 }
 0x260   :  { %v1087_v60 = vpop.f32.mrf.mxu1 }
 0x261   :  { %v854_v61 = vsub.f32 %v1087_v60, %v852_v49 }
 0x262   :  { %v526_v62 = vpop.f32.mrf.mxu1 }
 0x263   :  { %v853_v6 = vsub.f32 %v526_v62, %v851_v2 }
 0x264   :  { %v1113_v0 = vpop.f32.mrf.mxu0  ;;  %v1120_v1 = vpop.f32.mrf.mxu1 }
 0x265   :  { %v858_v3 = vsub.f32 %v1113_v0, %v856_v50 }
 0x266   :  { %v684_v4 = vpop.f32.mrf.mxu0  ;;  %v761_v5 = vpop.f32.mrf.mxu1 }
 0x267   :  { %v880_v7 = vadd.f32 %v858_v3, %v854_v61  ;;  %v857_v8 = vsub.f32 %v684_v4, %v855_v63  ;;  %1137 = vmatprep.mubr.msk.f32.mxu1 %vm139_vm1, %v761_v5 }
 0x268   :  { %1138 = vmatmul.mubr.msk.f32.vlgmr.msra.gmra.mxu1 %vm139_vm1, %v1120_v1 }
 0x269   :  { %v882_v11 = vadd.f32 0.0009, %v880_v7  ;;  %v879_v12 = vadd.f32 %v857_v8, %v853_v6 }
 0x26b   :  { %v884_v13 = vmul.f32 %v882_v11, %v878_v10  ;;  %v881_v15 = vadd.f32 0.0009, %v879_v12 }
 0x26d   :  { %v883_v16 = vmul.f32 %v881_v15, %v877_v14  ;;  %1143 = vrcp.f32 %v884_v13 }
 0x26f   :  { %1145 = vrcp.f32 %v883_v16 }
 0x27a   :  { %v1144_v31 = vpop.eup %1143 }
 0x27c   :  { %v1146_v34 = vpop.eup %1145 }
 0x328   :  { %v1139_v17 = vpop.f32.mrf.mxu1 }
 0x329   :  { %v862_v19 = vsub.f32 %v1139_v17, %v1380_v51 }
 0x32a   :  { %v842_v21 = vpop.f32.mrf.mxu1 }
 0x32b   :  { %v870_v23 = vmul.f32 2.0, %v862_v19  ;;  %v861_v24 = vsub.f32 %v842_v21, %v859_v20 }
 0x32d   :  { %v872_v26 = vadd.f32 0.0009, %v870_v23  ;;  %v869_v27 = vmul.f32 2.0, %v861_v24 }
 0x32f   :  { %v874_v29 = vmul.f32 %v872_v26, %v868_v25  ;;  %v871_v30 = vadd.f32 0.0009, %v869_v27 }
 0x331   :  { %v873_v32 = vmul.f32 %v871_v30, %v867_v28  ;;  %v888_v33 = vmul.f32 %v1144_v31, %v874_v29 }
 0x333   :  { %v887_v35 = vmul.f32 %v1146_v34, %v873_v32  ;;  %v892_v37 = vsel %vm891_vm3, %v888_v33, 0.0 }
 0x335   :  { %v890_v36 = vsel %vm889_vm2, %v887_v35, 0.0 }
 0x336   :  { %v893_v38 = vadd.f32 %v892_v37, %v890_v36 }
 0x338   :  { %894 = vadd.xlane.f32.xlu0 %v893_v38 }
 0x3c1   :  { %v895_v39 = vpop.xlane.xlu0 %894 }
 0x3c2   :  { %v896_v40 = vrot.slane %v895_v39, 4 }
 0x3c4   :  { %v897_v41 = vadd.f32 %v896_v40, %v895_v39 }
 0x3c6   :  { %v898_v42 = vrot.slane %v897_v41, 2 }
 0x3c8   :  { %v899_v43 = vadd.f32 %v898_v42, %v897_v41 }
 0x3ca   :  { %v900_v44 = vrot.slane %v899_v43, 1 }
 0x3cc   :  { %v901_v45 = vadd.f32 %v900_v44, %v899_v43 }
 0x3ce   :  { %1140 = vpush %v901_v45 }
 0x3ff   :  { %s1141_s22 = spop %1140 }
 0x400   :  { %v903_v46 = vstv %s1141_s22 }
 0x401   :  { %905 = vst.msk [vmem:[#allocation2] sm:$0x1] %vm904_vm4, %v903_v46 }
 0x402   :  { %1158 = shalt.err (!%p1155_p4)
}
 0x403   :  { %915 = dma.vmem_to_hbm [thread:$0]  %s913_s21, 16, %s1426_s5, [#allocation3]  }
 0x404   :  { %1167 = dma.done.wait [#allocation3], 16  }
 0x405   :  { %1168 = vsyncadd [#allocation3], 4294967280 }
 0x406   :  { %919 = vsyncpa [#allocation3], 1 }

</bundles_post_ra>
